<compile_context>
chip_gen: v6e
topology: v6e:2x2x1
jax: 0.10.0
libtpu: 0.0.40
codegen_flags: <defaults>
</compile_context>

<pallas_src>
import functools

import jax
import jax.numpy as jnp
from jax.experimental import pallas as pl
from jax.experimental.pallas import tpu as pltpu


def _round_up(x: int, m: int) -> int:
    return ((x + m - 1) // m) * m


def _logreg_forward_kernel(x_ref, w_ref, b_ref, o_ref):
    # x_ref : (tm, D)     bf16 row tile of X
    # w_ref : (D, d_pad)  bf16 pre-transposed weight, resident every grid step
    # b_ref : (1, d)      f32 bias row (unpadded)
    # o_ref : (tm, d)     f32 narrow output tile (masked store, small total bytes)
    d = o_ref.shape[-1]
    acc = jnp.dot(x_ref[...], w_ref[...], preferred_element_type=jnp.float32)
    o_ref[...] = (acc[:, :d] + b_ref[...]).astype(o_ref.dtype)


def _choose_tm(N, D, d_pad, d, *, budget_bytes=24 << 20, min_grid=4):
    """Row tile: as large as useful (<=512, ~85% of HBM roofline) while staying
    inside a conservative VMEM budget and guaranteeing at least `min_grid`
    grid steps (>= 2 per TensorCore on a 2-TC v7x chip) so the pipeline can
    actually prefetch/writeback under the matmul."""
    fixed = 2 * (D * d_pad * 2 + d * 4)      # resident bf16 weight + f32 bias (x2 conservative)
    per_row = 2 * (D * 2 + d * 4)            # double-buffered bf16 X tile + f32 out tile
    if fixed >= budget_bytes:
        # TODO(synk): for very large D add a K-reduction grid axis with an f32
        # VMEM accumulator (pl.when init/finalize) instead of shrinking tm.
        raise ValueError("weight does not fit the VMEM tiling budget; K-tiling needed")
    tm = (budget_bytes - fixed) // per_row
    tm = min(tm, 512)                        # 512 rows already amortize step overhead
    if N >= min_grid * 8:                    # grid-count-aware cap (>=2 steps per TC on v7x)
        tm = min(tm, (N // min_grid) // 8 * 8)
    tm = min(tm, _round_up(N, 8))
    tm = max(8, (tm // 8) * 8)               # f32/bf16 sublane-friendly multiple of 8
    return int(tm)


@functools.partial(jax.jit, static_argnames=("tm",))
def _logreg_forward_call(x, w_t, b_row, *, tm):
    N, D = x.shape
    d_pad = w_t.shape[1]
    d = b_row.shape[1]
    grid = (pl.cdiv(N, tm),)

    x_spec = pl.BlockSpec((tm, D), lambda i: (i, 0))
    if grid[0] >= 16:
        # Long grid: deepen input pipelining to hide per-step DMA issue latency.
        x_spec = pl.BlockSpec((tm, D), lambda i: (i, 0), pipeline_mode=pl.Buffered(3))

    cost = pl.CostEstimate(
        flops=2 * N * D * d_pad,
        transcendentals=0,
        bytes_accessed=2 * N * D + 2 * D * d_pad + 4 * d + 4 * N * d,
    )

    return pl.pallas_call(
        _logreg_forward_kernel,
        out_shape=jax.ShapeDtypeStruct((N, d), jnp.float32),
        grid_spec=pltpu.PrefetchScalarGridSpec(
            num_scalar_prefetch=0,
            grid=grid,
            in_specs=[
                x_spec,                                      # row tile of X (bf16)
                pl.BlockSpec((D, d_pad), lambda i: (0, 0)),  # pre-transposed weight (bf16)
                pl.BlockSpec((1, d), lambda i: (0, 0)),      # bias row (f32)
            ],
            out_specs=pl.BlockSpec((tm, d), lambda i: (i, 0)),
        ),
        compiler_params=pltpu.CompilerParams(
            dimension_semantics=("parallel",),   # row tiles shard across v7x's 2 TCs
            vmem_limit_bytes=32 << 20,
        ),
        cost_estimate=cost,
    )(x, w_t, b_row)


def prepare_params(w, b):
    """One-time parameter prep (outside the hot path): transpose the nn.Linear
    weight (d, D) to lane-dense bf16 (D, d_pad); keep the f32 bias as a (1, d) row.

    w: (d, D) float32  (nn.Linear.weight layout)
    b: (d,)   float32  (nn.Linear.bias)
    """
    d, D = w.shape
    d_pad = _round_up(max(d, 1), 128)
    w_t = jnp.zeros((D, d_pad), jnp.bfloat16).at[:, :d].set(w.T.astype(jnp.bfloat16))
    b_row = b.reshape(1, d).astype(jnp.float32)
    return w_t, b_row


def logreg_forward(x, w_t, b_row):
    """logits = x @ W.T + b  (bf16 matmul, f32 accumulation, f32 (N, d) output)."""
    N, D = x.shape
    d_pad = w_t.shape[1]
    d = b_row.shape[1]
    # bf16 X halves the dominant HBM read stream; in a fused pipeline the
    # producer should emit bf16 directly so this cast disappears entirely.
    x_bf16 = x if x.dtype == jnp.bfloat16 else x.astype(jnp.bfloat16)
    tm = _choose_tm(N, D, d_pad, d)
    return _logreg_forward_call(x_bf16, w_t, b_row, tm=tm)


if __name__ == "__main__":
    # Small shapes consistent with the module: X is (N, D); output_dim d is the
    # number of one-hot target columns (multi-class logits).
    N, D, d = 1024, 64, 8

    key = jax.random.PRNGKey(0)
    kx, kw, kb = jax.random.split(key, 3)

    x = jax.random.normal(kx, (N, D), dtype=jnp.float32)
    # Deterministic synthetic "fitted" parameters (stand-in for the Adam-trained
    # nn.Linear; the training loop itself is not part of the forward hot path).
    w = jax.random.normal(kw, (d, D), dtype=jnp.float32) * 0.1   # nn.Linear.weight
    b = jax.random.normal(kb, (d,), dtype=jnp.float32) * 0.1     # nn.Linear.bias

    # One-time parameter prep (transpose + pad + bf16 cast), outside the hot path.
    w_t, b_row = prepare_params(w, b)

    out = logreg_forward(x, w_t, b_row)
    out = jax.block_until_ready(out)

    assert out.shape == (N, d)
    assert out.dtype == jnp.float32

    # Reference with the same bf16 inputs / f32 accumulation (tight tolerance).
    x_bf = x.astype(jnp.bfloat16).astype(jnp.float32)
    w_bf = w.astype(jnp.bfloat16).astype(jnp.float32)
    ref_bf16 = x_bf @ w_bf.T + b[None, :]
    assert jnp.allclose(out, ref_bf16, atol=1e-3, rtol=1e-3)

    # Full-f32 PyTorch-forward reference (loosened tolerance for bf16 inputs).
    ref_f32 = x @ w.T + b[None, :]
    assert jnp.allclose(out, ref_f32, atol=5e-2, rtol=5e-2)

    print("KERNEL_OK")
</pallas_src>

<mosaic_0001>
module attributes {stable_mosaic.version = 11 : i64} {
  func.func @_logreg_forward_kernel(%arg0: i32, %arg1: memref<256x64xbf16, #tpu.memory_space<vmem>>, %arg2: memref<64x128xbf16, #tpu.memory_space<vmem>>, %arg3: memref<1x8xf32, #tpu.memory_space<vmem>>, %arg4: memref<256x8xf32, #tpu.memory_space<vmem>>) attributes {dimension_semantics = [#tpu.dimension_semantics<parallel>], iteration_bounds = array<i64: 4>, scalar_prefetch = 0 : i64, scratch_operands = 0 : i64, tpu.core_type = #tpu.core_type<tc>, window_params = [{transform_indices = @transform_0, window_bounds = array<i64: 256, 64>}, {pipeline_mode = #tpu.pipeline_mode<synchronous>, transform_indices = @transform_1, window_bounds = array<i64: 64, 128>}, {pipeline_mode = #tpu.pipeline_mode<synchronous>, transform_indices = @transform_2, window_bounds = array<i64: 1, 8>}, {transform_indices = @transform_3, window_bounds = array<i64: 256, 8>}]} {
    %c0 = arith.constant 0 : index
    %c0_0 = arith.constant 0 : index
    %0 = vector.load %arg1[%c0, %c0_0] : memref<256x64xbf16, #tpu.memory_space<vmem>>, vector<256x64xbf16>
    %c0_1 = arith.constant 0 : index
    %c0_2 = arith.constant 0 : index
    %1 = vector.load %arg2[%c0_1, %c0_2] : memref<64x128xbf16, #tpu.memory_space<vmem>>, vector<64x128xbf16>
    %cst = arith.constant dense<0.000000e+00> : vector<256x128xf32>
    %2 = tpu.matmul %0, %1, %cst {dimension_numbers = #tpu.dot_dimension_numbers<[1], [0], [0], [1], [0, 0, 1, 1], [], []>} : vector<256x64xbf16>, vector<64x128xbf16>, vector<256x128xf32> -> vector<256x128xf32>
    %3 = vector.extract_strided_slice %2 {offsets = [0, 0], sizes = [256, 8], strides = [1, 1]} : vector<256x128xf32> to vector<256x8xf32>
    %c0_3 = arith.constant 0 : index
    %c0_4 = arith.constant 0 : index
    %4 = vector.load %arg3[%c0_3, %c0_4] : memref<1x8xf32, #tpu.memory_space<vmem>>, vector<1x8xf32>
    %5 = vector.broadcast %4 : vector<1x8xf32> to vector<256x8xf32>
    %6 = arith.addf %3, %5 : vector<256x8xf32>
    %c0_5 = arith.constant 0 : index
    %c0_6 = arith.constant 0 : index
    %7 = vector.load %arg4[%c0_5, %c0_6] : memref<256x8xf32, #tpu.memory_space<vmem>>, vector<256x8xf32>
    tpu.vector_store %arg4[%c0_5, %c0_6], %6 {strides = array<i32>} : memref<256x8xf32, #tpu.memory_space<vmem>>, vector<256x8xf32>,
    return
  }
  func.func @transform_0(%arg0: i32) -> (i32, i32) {
    %c0_i32 = arith.constant 0 : i32
    %c0_i32_0 = arith.constant 0 : i32
    return %arg0, %c0_i32 : i32, i32
  }
  func.func @transform_1(%arg0: i32) -> (i32, i32) {
    %c0_i32 = arith.constant 0 : i32
    %c0_i32_0 = arith.constant 0 : i32
    %c0_i32_1 = arith.constant 0 : i32
    return %c0_i32, %c0_i32_0 : i32, i32
  }
  func.func @transform_2(%arg0: i32) -> (i32, i32) {
    %c0_i32 = arith.constant 0 : i32
    %c0_i32_0 = arith.constant 0 : i32
    %c0_i32_1 = arith.constant 0 : i32
    return %c0_i32, %c0_i32_0 : i32, i32
  }
  func.func @transform_3(%arg0: i32) -> (i32, i32) {
    %c0_i32 = arith.constant 0 : i32
    %c0_i32_0 = arith.constant 0 : i32
    return %arg0, %c0_i32 : i32, i32
  }
}

</mosaic_0001>

<bundles_post_ra>
// kernel: _logreg_forward_call.1
= control target key start
LH: loop header
LB: loop body
LE: loop exit
PB: predicated region body
PF: predicated region fallthrough
CT: control target
= control target key end

     0   :  { %s829_s12 = smov 0   ;;  %s999_s0 = inlined_call_operand.vmem [shape: bf16[1024,64], index: 0, kind: input, shape index: {}]   ;;  %s1000_s1 = inlined_call_operand.vmem [shape: bf16[64,128], index: 1, kind: input, shape index: {}]   ;;  %s1001_s2 = inlined_call_operand.vmem [shape: f32[1,8], index: 2, kind: input, shape index: {}]   ;;  %s1002_s3 = inlined_call_operand.vmem [shape: f32[1024,8], index: 3, kind: output, shape index: {}]  }
   0x1 LB: > { %s657_s13 = sadd.s32 4294967295, %s807_s12   ;;  %p661_p0 = scmp.ge.s32.totalorder %s807_s12, 1  ;;  %s807_s12 = sphi %s829_s12, %s13_s12  }
   0x2   : > { %p138_p1 = scmp.lt.s32.totalorder %s807_s12, 5 }
   0x4   : > { %p139_p2 = pnand %p661_p0, %p138_p1 }
   0x5   : > { %s662_s16 = sshll.u32 (!%p139_p2), %s657_s13, 5 }
   0x6   : > { %142 = sbr.rel (%p139_p2) target bundleno = 254 (0xfe), region = 32  ;;  %p163_p3 = scmp.lt.s32.totalorder (!%p139_p2), %s662_s16, 127 }
   0xb   : > { %v781_v0 = vld [vmem:[%s1000_s1 + $0x18] sm:$0xff]   ;;  %v782_v1 = vld [vmem:[%s1000_s1 + $0x10] sm:$0xff]   ;;  %s1004_s16 = smov (!%p163_p3, %s662_s16), 127  ;;  %v783_v2 = vld [vmem:[%s1000_s1 + $0x8] sm:$0xff]   ;;  %vm319_vm0 = vcmask 523264   ;;  %vm568_vm1 = vcmask 64512  }
   0xc   : > { %725 = vmatprep.subr.bf16.mxu0 %v781_v0  ;;  %765 = vmatprep.subr.bf16.mxu1 %v781_v0  ;;  %s663_s21 = sshll.u32 %s1004_s16, 2  ;;  %v784_v3 = vld [vmem:[%s1000_s1] sm:$0xff]   ;;  %s665_s27 = sshll.u32 %s1004_s16, 3 }
   0xd   : > { %726 = vmatpush3.bf16.msra.mxu0 %v781_v0  ;;  %769 = vmatpush3.bf16.msra.mxu1 %v781_v0  ;;  %s855_s26 = scalar_lea.vmem %s999_s0, %s663_s21  ;;  %v893_v20 = vld [vmem:[%s1001_s2] ss:$0 sm:$0xff]  ;;  %s898_s5 = scalar_lea.vmem %s1002_s3, %s665_s27 }
   0xe   : > { %727 = vmatprep.subr.bf16.mxu0 %v782_v1  ;;  %766 = vmatprep.subr.bf16.mxu1 %v782_v1  ;;  %v785_v4 = vld [vmem:[%s855_s26] sm:$0xff]   ;;  %v787_v6 = vld [vmem:[%s855_s26 + $0x8] sm:$0xff]   ;;  %v789_v8 = vld [vmem:[%s855_s26 + $0x10] sm:$0xff]  }
   0xf   : > { %v786_v5 = vld [vmem:[%s855_s26 + $0x40] sm:$0xff]   ;;  %733 = vmatprep.mubr.msk.bf16.mxu0 %vm319_vm0, %v785_v4  ;;  %v788_v7 = vld [vmem:[%s855_s26 + $0x48] sm:$0xff]   ;;  %v790_v9 = vld [vmem:[%s855_s26 + $0x50] sm:$0xff]  }
  0x10   : > { %749 = vmatprep.mubr.msk.bf16.mxu1 %vm319_vm0, %v786_v5  ;;  %v791_v10 = vld [vmem:[%s855_s26 + $0x18] sm:$0xff]   ;;  %v793_v12 = vld [vmem:[%s855_s26 + $0x20] sm:$0xff]   ;;  %v795_v14 = vld [vmem:[%s855_s26 + $0x28] sm:$0xff]  }
  0x11   : > { %728 = vmatpush3.bf16.msra.mxu0 %v782_v1  ;;  %770 = vmatpush3.bf16.msra.mxu1 %v782_v1  ;;  %v792_v11 = vld [vmem:[%s855_s26 + $0x58] sm:$0xff]   ;;  %v794_v13 = vld [vmem:[%s855_s26 + $0x60] sm:$0xff]   ;;  %v796_v15 = vld [vmem:[%s855_s26 + $0x68] sm:$0xff]  }
  0x12   : > { %729 = vmatprep.subr.bf16.mxu0 %v783_v2  ;;  %767 = vmatprep.subr.bf16.mxu1 %v783_v2  ;;  %v797_v16 = vld [vmem:[%s855_s26 + $0x30] sm:$0xff]   ;;  %v799_v18 = vld [vmem:[%s855_s26 + $0x38] sm:$0xff]  }
  0x13   : > { %v798_v17 = vld [vmem:[%s855_s26 + $0x70] sm:$0xff]   ;;  %v800_v19 = vld [vmem:[%s855_s26 + $0x78] sm:$0xff]  }
  0x15   : > { %730 = vmatpush3.bf16.msra.mxu0 %v783_v2  ;;  %771 = vmatpush3.bf16.msra.mxu1 %v783_v2 }
  0x16   : > { %731 = vmatprep.subr.bf16.mxu0 %v784_v3  ;;  %768 = vmatprep.subr.bf16.mxu1 %v784_v3 }
  0x19   : > { %732 = vmatpush3.bf16.msra.mxu0 %v784_v3  ;;  %772 = vmatpush3.bf16.msra.mxu1 %v784_v3 }
  0x1c   : > { %734 = vmatmul.mubr.msk.bf16.vlgmr.msra.gmra.mxu0 %vm319_vm0, %v787_v6  ;;  %750 = vmatmul.mubr.msk.bf16.vlgmr.msra.gmra.mxu1 %vm319_vm0, %v788_v7 }
  0x1d   : > { %737 = vmatprep.mubr.msk.bf16.mxu0 %vm319_vm0, %v789_v8  ;;  %753 = vmatprep.mubr.msk.bf16.mxu1 %vm319_vm0, %v790_v9 }
  0x24   : > { %738 = vmatmul.mubr.msk.bf16.gmra.mxu0 %vm319_vm0, %v791_v10  ;;  %754 = vmatmul.mubr.msk.bf16.gmra.mxu1 %vm319_vm0, %v792_v11 }
  0x25   : > { %741 = vmatprep.mubr.msk.bf16.mxu0 %vm319_vm0, %v793_v12  ;;  %757 = vmatprep.mubr.msk.bf16.mxu1 %vm319_vm0, %v794_v13 }
  0x2c   : > { %742 = vmatmul.mubr.msk.bf16.gmra.mxu0 %vm319_vm0, %v795_v14  ;;  %758 = vmatmul.mubr.msk.bf16.gmra.mxu1 %vm319_vm0, %v796_v15 }
  0x2d   : > { %745 = vmatprep.mubr.msk.bf16.mxu0 %vm319_vm0, %v797_v16  ;;  %761 = vmatprep.mubr.msk.bf16.mxu1 %vm319_vm0, %v798_v17 }
  0x34   : > { %746 = vmatmul.mubr.msk.bf16.gmra.mxu0 %vm319_vm0, %v799_v18  ;;  %762 = vmatmul.mubr.msk.bf16.gmra.mxu1 %vm319_vm0, %v800_v19 }
  0xdc   : > { %v735_v21 = vpop.f32.mrf.mxu0  ;;  %v751_v22 = vpop.f32.mrf.mxu1 }
  0xdd   : > { %v538_v23 = vadd.f32 %v735_v21, %v893_v20  ;;  %v554_v24 = vadd.f32 %v751_v22, %v893_v20 }
  0xde   : > { %v402_v25 = vpop.f32.mrf.mxu0  ;;  %v466_v26 = vpop.f32.mrf.mxu1 }
  0xdf   : > { %571 = vst.msk [vmem:[%s898_s5 + $0x10] sm:$0xff] %vm568_vm1, %v538_v23  ;;  %587 = vst.msk [vmem:[%s898_s5 + $0x90] sm:$0xff] %vm568_vm1, %v554_v24  ;;  %v536_v27 = vadd.f32 %v893_v20, %v402_v25  ;;  %v552_v28 = vadd.f32 %v893_v20, %v466_v26 }
  0xe0   : > { %v736_v29 = vpop.f32.mrf.mxu0  ;;  %v752_v30 = vpop.f32.mrf.mxu1 }
  0xe1   : > { %569 = vst.msk [vmem:[%s898_s5] sm:$0xff] %vm568_vm1, %v536_v27  ;;  %585 = vst.msk [vmem:[%s898_s5 + $0x80] sm:$0xff] %vm568_vm1, %v552_v28  ;;  %v539_v31 = vadd.f32 %v736_v29, %v893_v20  ;;  %v555_v32 = vadd.f32 %v752_v30, %v893_v20 }
  0xe2   : > { %v405_v33 = vpop.f32.mrf.mxu0  ;;  %v469_v34 = vpop.f32.mrf.mxu1 }
  0xe3   : > { %572 = vst.msk [vmem:[%s898_s5 + $0x18] sm:$0xff] %vm568_vm1, %v539_v31  ;;  %588 = vst.msk [vmem:[%s898_s5 + $0x98] sm:$0xff] %vm568_vm1, %v555_v32  ;;  %v537_v35 = vadd.f32 %v893_v20, %v405_v33  ;;  %v553_v36 = vadd.f32 %v893_v20, %v469_v34 }
  0xe4   : > { %v739_v37 = vpop.f32.mrf.mxu0  ;;  %v755_v38 = vpop.f32.mrf.mxu1 }
  0xe5   : > { %570 = vst.msk [vmem:[%s898_s5 + $0x8] sm:$0xff] %vm568_vm1, %v537_v35  ;;  %586 = vst.msk [vmem:[%s898_s5 + $0x88] sm:$0xff] %vm568_vm1, %v553_v36  ;;  %v542_v39 = vadd.f32 %v739_v37, %v893_v20  ;;  %v558_v40 = vadd.f32 %v755_v38, %v893_v20 }
  0xe6   : > { %v418_v41 = vpop.f32.mrf.mxu0  ;;  %v482_v42 = vpop.f32.mrf.mxu1 }
  0xe7   : > { %575 = vst.msk [vmem:[%s898_s5 + $0x30] sm:$0xff] %vm568_vm1, %v542_v39  ;;  %591 = vst.msk [vmem:[%s898_s5 + $0xb0] sm:$0xff] %vm568_vm1, %v558_v40  ;;  %v540_v43 = vadd.f32 %v893_v20, %v418_v41  ;;  %v556_v44 = vadd.f32 %v893_v20, %v482_v42 }
  0xe8   : > { %v740_v45 = vpop.f32.mrf.mxu0  ;;  %v756_v46 = vpop.f32.mrf.mxu1 }
  0xe9   : > { %573 = vst.msk [vmem:[%s898_s5 + $0x20] sm:$0xff] %vm568_vm1, %v540_v43  ;;  %589 = vst.msk [vmem:[%s898_s5 + $0xa0] sm:$0xff] %vm568_vm1, %v556_v44  ;;  %v543_v47 = vadd.f32 %v740_v45, %v893_v20  ;;  %v559_v48 = vadd.f32 %v756_v46, %v893_v20 }
  0xea   : > { %v421_v49 = vpop.f32.mrf.mxu0  ;;  %v485_v50 = vpop.f32.mrf.mxu1 }
  0xeb   : > { %576 = vst.msk [vmem:[%s898_s5 + $0x38] sm:$0xff] %vm568_vm1, %v543_v47  ;;  %592 = vst.msk [vmem:[%s898_s5 + $0xb8] sm:$0xff] %vm568_vm1, %v559_v48  ;;  %v541_v51 = vadd.f32 %v893_v20, %v421_v49  ;;  %v557_v52 = vadd.f32 %v893_v20, %v485_v50 }
  0xec   : > { %v743_v53 = vpop.f32.mrf.mxu0  ;;  %v759_v54 = vpop.f32.mrf.mxu1 }
  0xed   : > { %574 = vst.msk [vmem:[%s898_s5 + $0x28] sm:$0xff] %vm568_vm1, %v541_v51  ;;  %590 = vst.msk [vmem:[%s898_s5 + $0xa8] sm:$0xff] %vm568_vm1, %v557_v52  ;;  %v546_v55 = vadd.f32 %v743_v53, %v893_v20  ;;  %v562_v56 = vadd.f32 %v759_v54, %v893_v20 }
  0xee   : > { %v434_v57 = vpop.f32.mrf.mxu0  ;;  %v498_v58 = vpop.f32.mrf.mxu1 }
  0xef   : > { %579 = vst.msk [vmem:[%s898_s5 + $0x50] sm:$0xff] %vm568_vm1, %v546_v55  ;;  %595 = vst.msk [vmem:[%s898_s5 + $0xd0] sm:$0xff] %vm568_vm1, %v562_v56  ;;  %v544_v59 = vadd.f32 %v893_v20, %v434_v57  ;;  %v560_v60 = vadd.f32 %v893_v20, %v498_v58 }
  0xf0   : > { %v744_v61 = vpop.f32.mrf.mxu0  ;;  %v760_v62 = vpop.f32.mrf.mxu1 }
  0xf1   : > { %577 = vst.msk [vmem:[%s898_s5 + $0x40] sm:$0xff] %vm568_vm1, %v544_v59  ;;  %593 = vst.msk [vmem:[%s898_s5 + $0xc0] sm:$0xff] %vm568_vm1, %v560_v60  ;;  %v547_v63 = vadd.f32 %v744_v61, %v893_v20  ;;  %v563_v0 = vadd.f32 %v760_v62, %v893_v20 }
  0xf2   : > { %v437_v1 = vpop.f32.mrf.mxu0  ;;  %v501_v2 = vpop.f32.mrf.mxu1 }
  0xf3   : > { %580 = vst.msk [vmem:[%s898_s5 + $0x58] sm:$0xff] %vm568_vm1, %v547_v63  ;;  %596 = vst.msk [vmem:[%s898_s5 + $0xd8] sm:$0xff] %vm568_vm1, %v563_v0  ;;  %v545_v3 = vadd.f32 %v893_v20, %v437_v1  ;;  %v561_v4 = vadd.f32 %v893_v20, %v501_v2 }
  0xf4   : > { %v747_v5 = vpop.f32.mrf.mxu0  ;;  %v763_v6 = vpop.f32.mrf.mxu1 }
  0xf5   : > { %578 = vst.msk [vmem:[%s898_s5 + $0x48] sm:$0xff] %vm568_vm1, %v545_v3  ;;  %594 = vst.msk [vmem:[%s898_s5 + $0xc8] sm:$0xff] %vm568_vm1, %v561_v4  ;;  %v550_v7 = vadd.f32 %v747_v5, %v893_v20  ;;  %v566_v8 = vadd.f32 %v763_v6, %v893_v20 }
  0xf6   : > { %v450_v9 = vpop.f32.mrf.mxu0  ;;  %v514_v10 = vpop.f32.mrf.mxu1 }
  0xf7   : > { %583 = vst.msk [vmem:[%s898_s5 + $0x70] sm:$0xff] %vm568_vm1, %v550_v7  ;;  %599 = vst.msk [vmem:[%s898_s5 + $0xf0] sm:$0xff] %vm568_vm1, %v566_v8  ;;  %v548_v11 = vadd.f32 %v893_v20, %v450_v9  ;;  %v564_v12 = vadd.f32 %v893_v20, %v514_v10 }
  0xf8   : > { %v748_v13 = vpop.f32.mrf.mxu0  ;;  %v764_v14 = vpop.f32.mrf.mxu1 }
  0xf9   : > { %581 = vst.msk [vmem:[%s898_s5 + $0x60] sm:$0xff] %vm568_vm1, %v548_v11  ;;  %597 = vst.msk [vmem:[%s898_s5 + $0xe0] sm:$0xff] %vm568_vm1, %v564_v12  ;;  %v551_v15 = vadd.f32 %v748_v13, %v893_v20  ;;  %v567_v16 = vadd.f32 %v764_v14, %v893_v20 }
  0xfa   : > { %v453_v17 = vpop.f32.mrf.mxu0  ;;  %v517_v18 = vpop.f32.mrf.mxu1 }
  0xfb   : > { %584 = vst.msk [vmem:[%s898_s5 + $0x78] sm:$0xff] %vm568_vm1, %v551_v15  ;;  %600 = vst.msk [vmem:[%s898_s5 + $0xf8] sm:$0xff] %vm568_vm1, %v567_v16  ;;  %v549_v19 = vadd.f32 %v893_v20, %v453_v17  ;;  %v565_v21 = vadd.f32 %v893_v20, %v517_v18 }
  0xfd   : > { %582 = vst.msk [vmem:[%s898_s5 + $0x68] sm:$0xff] %vm568_vm1, %v549_v19  ;;  %598 = vst.msk [vmem:[%s898_s5 + $0xe8] sm:$0xff] %vm568_vm1, %v565_v21 }
  0xfe PF: > { %s13_s12 = sadd.s32 1, %s807_s12  }
  0xff   : > { %p10_p4 = scmp.ge.s32.totalorder %s13_s12, 6  }
 0x101   :  { %12 = sbr.rel (!%p10_p4) target bundleno = 1 (0x1), region = 62 }

</bundles_post_ra>
